<compile_context>
chip_gen: v6e
topology: v6e:2x2x1
jax: 0.10.0
libtpu: 0.0.40
codegen_flags: <defaults>
</compile_context>

<pallas_src>
import jax
import jax.numpy as jnp
from jax.experimental import pallas as pl
from jax.experimental.pallas import tpu as pltpu


def _round_up(a, b):
    return (a + b - 1) // b * b


def _largest_divisor_tile(n, candidates):
    for c in candidates:
        if n % c == 0:
            return c
    return None


# --------------------------- kernels ---------------------------------------

def _linear_kernel_single_k(x_ref, w_ref, b_ref, o_ref):
    # nk == 1: single MXU pass + bias add; no scratch, no branches.
    acc = jnp.dot(x_ref[...], w_ref[...], preferred_element_type=jnp.float32)
    o_ref[...] = (acc + b_ref[...]).astype(o_ref.dtype)


def _linear_kernel_multi_k(x_ref, w_ref, b_ref, o_ref):
    # nk > 1: accumulate directly into the f32 output block (its index_map
    # ignores k so the block stays VMEM-resident across the reduction axis).
    # Bias is folded into the k == 0 init, so there is no epilogue.
    @pl.when(pl.program_id(2) == 0)
    def _():
        o_ref[...] = jnp.broadcast_to(b_ref[...], o_ref.shape).astype(o_ref.dtype)

    o_ref[...] += jnp.dot(x_ref[...], w_ref[...],
                          preferred_element_type=jnp.float32)


# --------------------------- wrapper ----------------------------------------

def pallas_linear(x_flat, w_t, bias2d):
    """y = x_flat @ w_t + bias  (bf16 MXU inputs, f32 accumulation/output).

    x_flat : (M, K)  bf16
    w_t    : (K, N)  bf16, N a multiple of 128 (pre-padded at init)
    bias2d : (1, N)  f32
    returns (M, N)   f32
    """
    M, K = x_flat.shape
    K2, N = w_t.shape
    assert K == K2 and bias2d.shape == (1, N)
    assert N % 128 == 0

    # ---- M: avoid a per-call HBM pass over x. Pad only when M is not a
    # multiple of 16 (bf16 sublane minimum), which is rare.
    M_pad = _round_up(M, 16)
    if M_pad != M:
        x_flat = jnp.pad(x_flat, ((0, M_pad - M), (0, 0)))
    tm = _largest_divisor_tile(M_pad, (512, 256, 128, 64, 32, 16))

    # ---- K: single reduction step whenever K fits one tile; otherwise pick a
    # tk that divides K; pad K only as a last resort (zeros are inert).
    if K <= 2048:
        tk = K
    else:
        tk = _largest_divisor_tile(K, (2048, 1024, 512, 256, 128))
        if tk is None:
            tk = 512
    K_pad = _round_up(K, tk)
    if K_pad != K:
        x_flat = jnp.pad(x_flat, ((0, 0), (0, K_pad - K)))
        w_t = jnp.pad(w_t, ((0, K_pad - K), (0, 0)))
    nk = K_pad // tk

    # ---- N: 256-lane tiles fill the 256-wide MXU on v6e/v7x (N is pre-padded
    # to a multiple of 256 at init; 128 on the rare non-multiple-of-256 case).
    tn = 256 if N % 256 == 0 else 128

    # v7x has 2 TensorCores: make sure at least one "parallel" axis has >= 2
    # iterations so both cores get work.  No effect on single-TC v5e/v6e.
    if M_pad // tm == 1 and N // tn == 1:
        if N // 128 >= 2:
            tn = 128
        elif tm >= 32:
            tm //= 2

    grid_i, grid_j = M_pad // tm, N // tn

    in_itemsize = jnp.dtype(x_flat.dtype).itemsize
    cost = pl.CostEstimate(
        flops=2 * M_pad * N * K_pad,
        transcendentals=0,
        bytes_accessed=(M_pad * K_pad + K_pad * N) * in_itemsize + M_pad * N * 4,
    )

    if nk == 1:
        kernel = _linear_kernel_single_k
        grid = (grid_i, grid_j)
        sem = ("parallel", "parallel")
        x_spec = pl.BlockSpec((tm, tk), lambda i, j: (i, 0))
        w_spec = pl.BlockSpec((tk, tn), lambda i, j: (0, j))
        b_spec = pl.BlockSpec((1, tn), lambda i, j: (0, j))
        o_spec = pl.BlockSpec((tm, tn), lambda i, j: (i, j))
    else:
        kernel = _linear_kernel_multi_k
        grid = (grid_i, grid_j, nk)
        sem = ("parallel", "parallel", "arbitrary")
        x_spec = pl.BlockSpec((tm, tk), lambda i, j, k: (i, k))
        w_spec = pl.BlockSpec((tk, tn), lambda i, j, k: (k, j))
        b_spec = pl.BlockSpec((1, tn), lambda i, j, k: (0, j))
        o_spec = pl.BlockSpec((tm, tn), lambda i, j, k: (i, j))

    y = pl.pallas_call(
        kernel,
        out_shape=jax.ShapeDtypeStruct((M_pad, N), jnp.float32),
        grid_spec=pltpu.PrefetchScalarGridSpec(
            num_scalar_prefetch=0,
            grid=grid,
            in_specs=[x_spec, w_spec, b_spec],
            out_specs=o_spec,
        ),
        compiler_params=pltpu.CompilerParams(
            dimension_semantics=sem,
            vmem_limit_bytes=40 * 1024 * 1024,
        ),
        cost_estimate=cost,
    )(x_flat, w_t, bias2d)

    if M_pad != M:
        y = y[:M]
    return y


class FinalLayerPallas:
    """JAX/Pallas equivalent of the PyTorch FinalLayer module."""

    def __init__(self, dim_in, categories, num_cont_features, bias_init=None,
                 *, key=None):
        self.dim_in = dim_in
        self.categories = list(categories)
        self.num_cont_features = num_cont_features
        self.num_cat_features = len(categories)
        self.dim_out = sum(categories) + num_cont_features
        self.split_chunks = [self.num_cont_features, *self.categories]
        self.cat_idx = 1 if self.num_cont_features > 0 else 0

        # Pad output width to a multiple of 256 once at init so the kernel can
        # always use full-MXU-width, lane-dense output tiles.
        self.dim_out_padded = _round_up(max(self.dim_out, 1), 256)

        # Deterministic parameter init.  The PyTorch module zero-inits the
        # weight; small deterministic random values are used here so the matmul
        # path is actually exercised (zeros would also be valid).
        if key is None:
            key = jax.random.PRNGKey(0)
        kw, kb = jax.random.split(key)
        self.weight = 0.02 * jax.random.normal(
            kw, (self.dim_out, self.dim_in), dtype=jnp.float32)  # (out, in)
        if bias_init is None:
            self.bias = 0.02 * jax.random.normal(
                kb, (self.dim_out,), dtype=jnp.float32)
        else:
            self.bias = jnp.asarray(bias_init, dtype=jnp.float32)

        # Pre-transposed, column-padded bf16 weight (one-time cost); f32 bias.
        self.weight_t_padded = (
            jnp.zeros((self.dim_in, self.dim_out_padded), dtype=jnp.bfloat16)
            .at[:, :self.dim_out].set(self.weight.T.astype(jnp.bfloat16)))
        self.bias_padded = (
            jnp.zeros((1, self.dim_out_padded), dtype=jnp.float32)
            .at[0, :self.dim_out].set(self.bias))

    def __call__(self, x):
        # x: (..., dim_in)
        lead_shape = x.shape[:-1]
        x_flat = x.reshape(-1, self.dim_in).astype(jnp.bfloat16)
        y_pad = pallas_linear(x_flat, self.weight_t_padded, self.bias_padded)

        # torch.split along last dim, sliced directly from the padded kernel
        # output (no full-size intermediate copy).
        outs = []
        off = 0
        for c in self.split_chunks:
            outs.append(y_pad[:, off:off + c].reshape(*lead_shape, c))
            off += c

        cont_logits = outs[0] if self.num_cont_features > 0 else None
        cat_logits = tuple(outs[self.cat_idx:]) if self.num_cat_features > 0 else None
        return (cat_logits, cont_logits)


if __name__ == "__main__":
    # Small, deterministic example consistent with the module's forward:
    # batch=2, seq=8, dim_in=32; categories=[3, 5, 4]; 2 continuous features.
    key = jax.random.PRNGKey(0)
    k_x, k_params = jax.random.split(key)

    dim_in = 32
    categories = [3, 5, 4]
    num_cont_features = 2

    layer = FinalLayerPallas(dim_in, categories, num_cont_features, key=k_params)

    x = jax.random.normal(k_x, (2, 8, dim_in), dtype=jnp.float32)

    cat_logits, cont_logits = layer(x)
    jax.block_until_ready(cont_logits)
    jax.block_until_ready(cat_logits)

    # Reference: same bf16-rounded inputs, f32 accumulation in plain JAX.
    x_bf = x.astype(jnp.bfloat16).astype(jnp.float32)
    w_bf = layer.weight_t_padded[:, :layer.dim_out].astype(jnp.float32)
    y_ref = jnp.einsum('bsd,do->bso', x_bf, w_bf) + layer.bias

    cont_ref = y_ref[..., :num_cont_features]
    assert cont_logits.shape == (2, 8, num_cont_features)
    assert len(cat_logits) == len(categories)
    ok = bool(jnp.allclose(cont_logits, cont_ref, atol=1e-3))
    off = num_cont_features
    for c, cl in zip(categories, cat_logits):
        assert cl.shape == (2, 8, c)
        ok &= bool(jnp.allclose(cl, y_ref[..., off:off + c], atol=1e-3))
        off += c
    assert ok

    print("KERNEL_OK")
</pallas_src>

<mosaic_0001>
module attributes {stable_mosaic.version = 11 : i64} {
  func.func @_linear_kernel_single_k(%arg0: i32, %arg1: i32, %arg2: memref<16x32xbf16, #tpu.memory_space<vmem>>, %arg3: memref<32x128xbf16, #tpu.memory_space<vmem>>, %arg4: memref<1x128xf32, #tpu.memory_space<vmem>>, %arg5: memref<16x128xf32, #tpu.memory_space<vmem>>) attributes {dimension_semantics = [#tpu.dimension_semantics<parallel>, #tpu.dimension_semantics<parallel>], iteration_bounds = array<i64: 1, 2>, scalar_prefetch = 0 : i64, scratch_operands = 0 : i64, tpu.core_type = #tpu.core_type<tc>, window_params = [{transform_indices = @transform_0, window_bounds = array<i64: 16, 32>}, {transform_indices = @transform_1, window_bounds = array<i64: 32, 128>}, {transform_indices = @transform_2, window_bounds = array<i64: 1, 128>}, {transform_indices = @transform_3, window_bounds = array<i64: 16, 128>}]} {
    %c0 = arith.constant 0 : index
    %c0_0 = arith.constant 0 : index
    %0 = vector.load %arg2[%c0, %c0_0] : memref<16x32xbf16, #tpu.memory_space<vmem>>, vector<16x32xbf16>
    %c0_1 = arith.constant 0 : index
    %c0_2 = arith.constant 0 : index
    %1 = vector.load %arg3[%c0_1, %c0_2] : memref<32x128xbf16, #tpu.memory_space<vmem>>, vector<32x128xbf16>
    %cst = arith.constant dense<0.000000e+00> : vector<16x128xf32>
    %2 = tpu.matmul %0, %1, %cst {dimension_numbers = #tpu.dot_dimension_numbers<[1], [0], [0], [1], [0, 0, 1, 1], [], []>} : vector<16x32xbf16>, vector<32x128xbf16>, vector<16x128xf32> -> vector<16x128xf32>
    %c0_3 = arith.constant 0 : index
    %c0_4 = arith.constant 0 : index
    %3 = vector.load %arg4[%c0_3, %c0_4] : memref<1x128xf32, #tpu.memory_space<vmem>>, vector<1x128xf32>
    %4 = vector.broadcast %3 : vector<1x128xf32> to vector<16x128xf32>
    %5 = arith.addf %2, %4 : vector<16x128xf32>
    %c0_5 = arith.constant 0 : index
    %c0_6 = arith.constant 0 : index
    %6 = vector.load %arg5[%c0_5, %c0_6] : memref<16x128xf32, #tpu.memory_space<vmem>>, vector<16x128xf32>
    tpu.vector_store %arg5[%c0_5, %c0_6], %5 {strides = array<i32>} : memref<16x128xf32, #tpu.memory_space<vmem>>, vector<16x128xf32>,
    return
  }
  func.func @transform_0(%arg0: i32, %arg1: i32) -> (i32, i32) {
    %c0_i32 = arith.constant 0 : i32
    %c0_i32_0 = arith.constant 0 : i32
    return %arg0, %c0_i32 : i32, i32
  }
  func.func @transform_1(%arg0: i32, %arg1: i32) -> (i32, i32) {
    %c0_i32 = arith.constant 0 : i32
    %c0_i32_0 = arith.constant 0 : i32
    return %c0_i32, %arg1 : i32, i32
  }
  func.func @transform_2(%arg0: i32, %arg1: i32) -> (i32, i32) {
    %c0_i32 = arith.constant 0 : i32
    %c0_i32_0 = arith.constant 0 : i32
    return %c0_i32, %arg1 : i32, i32
  }
  func.func @transform_3(%arg0: i32, %arg1: i32) -> (i32, i32) {
    %c0_i32 = arith.constant 0 : i32
    return %arg0, %arg1 : i32, i32
  }
}

</mosaic_0001>

<bundles_post_ra>
// kernel: tpu_custom_call.1
= control target key start
LH: loop header
LB: loop body
LE: loop exit
PB: predicated region body
PF: predicated region fallthrough
CT: control target
= control target key end

     0   :  { %8 = vsyncpa [#allocation3], 0  ;;  %s912_s0 = inlined_call_operand.hbm [shape: bf16[16,32], index: 0, kind: input, shape index: {}]   ;;  %s913_s1 = inlined_call_operand.hbm [shape: bf16[32,256], index: 1, kind: input, shape index: {}]   ;;  %s914_s2 = inlined_call_operand.vmem [shape: f32[1,256], index: 2, kind: input, shape index: {}]   ;;  %s915_s3 = inlined_call_operand.hbm [shape: f32[16,256], index: 3, kind: output, shape index: {}]  }
   0x1   :  { %9 = vsyncpa [#allocation6], 0 }
   0x2   :  { %11 = vsyncpa [#allocation6 + $0x1], 0 }
   0x3   :  { %12 = vsyncpa [#allocation4], 0 }
   0x4   :  { %14 = vsyncpa [#allocation4 + $0x1], 0  ;;  %s727_s12 = smov 0   ;;  %s729_s13 = smov 0  }
   0x5   :  { %s731_s14 = smov 0   ;;  %s733_s15 = smov 0  }
   0x6   :  { %s735_s16 = smov 0   ;;  %s737_s17 = smov 0  }
   0x7 LB: > { %922 = sst [smem:[#allocation11_spill]] %s694_s17  ;;  %s441_s18 = sadd.s32 4294967295, %s694_s17   ;;  %s694_s17 = sphi %s737_s17, %s20_s17   ;;  %s690_s16 = sphi %s735_s16, %s943_s16   ;;  %s686_s15 = sphi %s733_s15, %s942_s15   ;;  %s682_s14 = sphi %s731_s14, %s941_s14   ;;  %s678_s13 = sphi %s729_s13, %s940_s13   ;;  %s674_s12 = sphi %s727_s12, %s939_s12  }
   0x8   : > { %s442_s19 = sadd.s32 4294967294, %s694_s17   ;;  %p72_p0 = scmp.ne.s32.totalorder %s682_s14, %s678_s13 }
   0x9   : > { %p73_p1 = scmp.eq.s32.totalorder %s694_s17, 0  ;;  %p78_p2 = scmp.ne.s32.totalorder %s678_s13, %s674_s12 }
   0xa   : > { %p764_p3 = scmp.eq.s32.totalorder %s441_s18, 0  ;;  %p130_p5 = scmp.eq.s32.totalorder %s441_s18, 1 }
   0xb   : > { %p768_p4 = por %p73_p1, %p72_p0  ;;  %p136_p7 = scmp.eq.s32.totalorder %s442_s19, 1 }
   0xc   : > { %p774_p6 = por %p764_p3, %p78_p2  ;;  %p778_p8 = por %p130_p5, %p72_p0 }
   0xd   : > { %p443_p9 = scmp.ge.s32.totalorder %s694_s17, 1  ;;  %p783_p10 = por %p136_p7, %p78_p2 }
   0xe   : > { %s925_s22 = scalar_select %p774_p6, 1, 0 }
   0xf   : > { %s926_s23 = scalar_select %p778_p8, 1, 0 }
  0x10   : > { %s927_s24 = scalar_select %p783_p10, 1, 0 }
  0x11   : > { %p143_p11 = scmp.lt.s32.totalorder %s694_s17, 3  ;;  %s696_s26 = smov [#allocation2]  }
  0x12   : > { %928 = sst [smem:[#allocation12_spill]] %s927_s24  ;;  %s158_s27 = sshll.u32 %s696_s26, 4  ;;  %s159_s27 = int_to_ptr.vmem [resolvable:$true] %s158_s27 }
  0x13   : > { %p788_p12 = pnand %p443_p9, %p143_p11  ;;  %p493_p1 = scmp.lt.s32.totalorder %s694_s17, 2 }
  0x14   : > { %s29_s30 = sadd.s32 1, %s690_s16  ;;  %s567_s4 = scalar_lea.vmem %s159_s27, 128 }
  0x15   : > { %p480_p13 = pneg %p788_p12  ;;  %p804_p2 = pnand %p493_p1, %p768_p4 }
  0x16   : > { %p568_p9 = scmp.ne.s32.totalorder %s159_s27, %s567_s4  ;;  %p575_p0 = scmp.lt.s32.totalorder %s159_s27, %s159_s27 }
  0x17   : > { %p798_p5 = pnand %p480_p13, %p764_p3  ;;  %p576_p8 = scmp.lt.s32.totalorder %s567_s4, %s567_s4 }
  0x19   : > { %p558_p7 = pneg %p798_p5  ;;  %p577_p6 = por %p576_p8, %p575_p0 }
  0x1b   : > { %p570_p11 = pnand %p568_p9, %p558_p7 }
  0x1d   : > { %p571_p10 = pneg %p570_p11 }
  0x1f   : > { %p578_p13 = pnand %p577_p6, %p571_p10 }
  0x21   : > { %581 = shalt.err (!%p578_p13)
}
  0x22   : > { %s921_s5 = smov 64   ;;  %s698_s6 = smov 4  }
  0x23   : > { %483 = dma.hbm_to_vmem [thread:$0]  (!%p798_p5), %s912_s0, 128, %s159_s27, [#allocation3], %s921_s5, %s921_s5, %s698_s6  }
  0x24   : > { %p30_p4 = scmp.ge.s32.totalorder %s29_s30, 2  ;;  %s65_s9 = sadd.s32 1, %s682_s14 }
  0x25   : > { %s172_s10 = sand.u32 1, %s682_s14   ;;  %s447_s19 = sshll.u32 %s690_s16, 6 }
  0x26   : > { %s945_s30 = smov (%p30_p4, %s29_s30), 0  ;;  %s446_s11 = sshll.u32 %s172_s10, 4 }
  0x27   : > { %s62_s18 = ssub.s32 %s690_s16, %s945_s30  ;;  %s181_s28 = scalar_lea.hbm %s913_s1, %s447_s19 }
  0x28   : > { %p63_p6 = scmp.eq.s32.totalorder %s62_s18, 0  ;;  %s176_s4 = scalar_lea.vmem [#allocation5], %s446_s11 }
  0x29   : > { %s182_s17 = sshll.u32 %s176_s4, 4  ;;  %s173_s27 = scalar_lea.sflag [#allocation6], %s172_s10  ;;  %s183_s17 = int_to_ptr.vmem [resolvable:$true] %s182_s17 }
  0x2a   : > { %s830_s24 = scalar_select %p63_p6, %s682_s14, %s65_s9  }
  0x2b   : > { %p584_p8 = pneg %p804_p2  ;;  %s595_s7 = scalar_lea.vmem %s183_s17, 256 }
  0x2c   : > { %p596_p10 = scmp.ne.s32.totalorder %s183_s17, %s595_s7  ;;  %s699_s8 = smov [#allocation5]  }
  0x2d   : > { %s600_s5 = sshll.u32 %s699_s8, 4  ;;  %s601_s5 = int_to_ptr.vmem [resolvable:$false] %s600_s5 }
  0x2e   : > { %p598_p0 = pnand %p596_p10, %p584_p8  ;;  %s602_s18 = scalar_lea.vmem %s601_s5, 512 }
  0x2f   : > { %p603_p5 = scmp.lt.s32.totalorder %s183_s17, %s601_s5  ;;  %p604_p7 = scmp.lt.s32.totalorder %s602_s18, %s595_s7 }
  0x30   : > { %p599_p1 = pneg %p598_p0 }
  0x31   : > { %p605_p9 = por %p604_p7, %p603_p5 }
  0x33   : > { %p606_p11 = pnand %p605_p9, %p599_p1 }
  0x35   : > { %609 = shalt.err (!%p606_p11)
}
  0x36   : > { %s700_s11 = smov 128   ;;  %s932_s9 = smov 64  }
  0x37   : > { %487 = dma.hbm_to_vmem [thread:$0]  (!%p804_p2), %s181_s28, 256, %s183_s17, %s173_s27, %s700_s11, %s932_s9, %s698_s6  }
  0x38   : > { %200 = sbr.rel (%p788_p12) target bundleno = 289 (0x121), region = 32 }
  0x3d   : > { %661 = dma.done.wait (%p764_p3), [#allocation3], 128  }
  0x3e   : > { %663 = vsyncadd (%p764_p3), [#allocation3], 4294967168  ;;  %s845_s5 = sand.u32 1, %s678_s13   ;;  %p933_p13 = scmp.ne.s32.totalorder %s925_s22, 0 }
  0x3f   : > { %s450_s10 = sshll.u32 %s845_s5, 4  ;;  %s207_s29 = scalar_lea.sflag [#allocation6], %s845_s5 }
  0x40   : > { %s210_s19 = scalar_lea.vmem [#allocation5], %s450_s10 }
  0x41   : > { %665 = dma.done.wait (%p933_p13), %s207_s29, 256  }
  0x42   : > { %667 = vsyncadd (%p933_p13), %s207_s29, 4294967040  ;;  %v701_v0 = vmov 0.0   ;;  %vm702_vm0 = vmmov 0   ;;  %v553_v1 = vld [vmem:[%s210_s19 + $0x8] sm:$0xff]   ;;  %v554_v2 = vld [vmem:[%s210_s19] sm:$0xff]   ;;  %vm272_vm1 = vcmask 261120  }
  0x43   : > { %464 = vmatprep.subr.bf16.mxu0 %v701_v0  ;;  %468 = vmatprep.mubr.msk.bf16.mxu0 %vm702_vm0, %v701_v0  ;;  %v555_v3 = vld [vmem:[#allocation2] sm:$0xff]   ;;  %p237_p3 = scmp.lt.s32.totalorder %s686_s15, 1  ;;  %s235_s6 = scalar_lea.vmem [#allocation7], %s450_s10 }
  0x44   : > { %465 = vmatpush3.bf16.msra.mxu0 %v553_v1  ;;  %s335_s21 = sshll.u32 %s235_s6, 4  ;;  %s458_s26 = sshll.u32 %s686_s15, 7  ;;  %s859_s21 = int_to_ptr.vmem [resolvable:$true] %s335_s21 }
  0x45   : > { %466 = vmatprep.subr.bf16.mxu0 %v701_v0  ;;  %s238_s17 = scalar_select %p237_p3, %s686_s15, 1 }
  0x46   : > { %s864_s27 = scalar_lea.hbm %s915_s3, %s458_s26  ;;  %s320_s7 = scalar_lea.sflag [#allocation4], %s845_s5 }
  0x47   : > { %s239_s25 = scalar_lea.vmem %s914_s2, %s238_s17  ;;  %s610_s8 = scalar_lea.vmem %s859_s21, 256 }
  0x48   : > { %467 = vmatpush3.bf16.msra.mxu0 %v554_v2  ;;  %v452_v4 = vld [vmem:[%s239_s25] ss:$0 sm:$0xff]  ;;  %p611_p12 = scmp.ne.s32.totalorder %s859_s21, %s610_s8  ;;  %p934_p2 = scmp.ne.s32.totalorder %s926_s23, 0 }
  0x49   : > { %s703_s15 = smov [#allocation7]  }
  0x4a   : > { %p612_p4 = pnand %p611_p12, %p934_p2  ;;  %s614_s18 = sshll.u32 %s703_s15, 4  ;;  %s615_s18 = int_to_ptr.vmem [resolvable:$false] %s614_s18 }
  0x4b   : > { %469 = vmatmul.mubr.msk.bf16.vlgmr.msra.gmra.mxu0 %vm272_vm1, %v555_v3  ;;  %s616_s11 = scalar_lea.vmem %s615_s18, 512  ;;  %p617_p8 = scmp.lt.s32.totalorder %s859_s21, %s615_s18 }
  0x4c   : > { %p613_p6 = pneg %p612_p4  ;;  %p618_p10 = scmp.lt.s32.totalorder %s616_s11, %s610_s8 }
  0x4e   : > { %p619_p0 = por %p618_p10, %p617_p8 }
  0x50   : > { %p620_p1 = pnand %p619_p0, %p613_p6 }
 0x10b   : > { %v310_v5 = vpop.f32.mrf.mxu0 }
 0x10c   : > { %v311_v6 = vadd.f32 %v452_v4, %v310_v5 }
 0x10d   : > { %v470_v7 = vpop.f32.mrf.mxu0 }
 0x10e   : > { %317 = vst [vmem:[%s235_s6] sm:$0xff] %v311_v6 }
 0x10f   : > { %v313_v8 = vpop.f32.mrf.mxu0 }
 0x110   : > { %v314_v9 = vadd.f32 %v452_v4, %v313_v8 }
 0x111   : > { %v471_v10 = vpop.f32.mrf.mxu0 }
 0x112   : > { %318 = vst [vmem:[%s235_s6 + $0x8] sm:$0xff] %v314_v9 }
 0x113   : > { %623 = shalt.err (!%p620_p1)
}
 0x114   : > { %s624_s9 = scalar_lea.hbm %s864_s27, 256  ;;  %s628_s19 = scalar_lea.hbm %s915_s3, 512 }
 0x115   : > { %p625_p5 = scmp.ne.s32.totalorder %s864_s27, %s624_s9  ;;  %p629_p11 = scmp.lt.s32.totalorder %s864_s27, %s915_s3 }
 0x116   : > { %p630_p13 = scmp.lt.s32.totalorder %s628_s19, %s624_s9 }
 0x117   : > { %p626_p7 = pnand %p625_p5, %p934_p2 }
 0x118   : > { %p631_p3 = por %p630_p13, %p629_p11 }
 0x119   : > { %p627_p9 = pneg %p626_p7 }
 0x11b   : > { %p632_p12 = pnand %p631_p3, %p627_p9 }
 0x11d   : > { %635 = shalt.err (!%p632_p12)
}
 0x11e   : > { %s704_s22 = smov 128   ;;  %s705_s25 = smov 256  }
 0x11f   : > { %s706_s6 = smov 8  }
 0x120   : > { %478 = dma.vmem_to_hbm [thread:$0]  (%p934_p2), %s859_s21, 256, %s864_s27, %s320_s7, %s704_s22, %s705_s25, %s706_s6  }
 0x121 PF: > { %s935_s26 = sld [smem:[#allocation12_spill]]  ;;  %s350_s4 = sand.u32 1, %s674_s12  }
 0x122   : > { %s936_s28 = sld [smem:[#allocation11_spill]]  ;;  %s351_s8 = scalar_lea.sflag [#allocation4], %s350_s4 }
 0x127   : > { %p937_p4 = scmp.ne.s32.totalorder %s935_s26, 0 }
 0x128   : > { %p938_p6 = scmp.ge.s32.totalorder %s936_s28, 2 }
 0x12a   : > { %p489_p8 = pnand %p938_p6, %p937_p4 }
 0x12c   : > { %p490_p10 = pneg %p489_p8 }
 0x12e   : > { %669 = dma.done.wait (%p490_p10), %s351_s8, 256  }
 0x12f   : > { %671 = vsyncadd (%p490_p10), %s351_s8, 4294967040  ;;  %s20_s17 = sadd.s32 1, %s936_s28   ;;  %s939_s12 = smov %s678_s13 }
 0x130   : > { %p17_p0 = scmp.ge.s32.totalorder %s20_s17, 4   ;;  %s940_s13 = smov %s682_s14 }
 0x131   : > { %s941_s14 = smov %s830_s24  ;;  %s942_s15 = smov %s690_s16 }
 0x132   : > { %s943_s16 = smov %s945_s30  ;;  %19 = sbr.rel (!%p17_p0) target bundleno = 7 (0x7), region = 86 }
 0x137   :  { %356 = vsyncpa [#allocation3], 1 }
 0x138   :  { %358 = vsyncpa [#allocation3 + $0x1], 1 }
 0x139   :  { %359 = vsyncpa [#allocation6], 1 }
 0x13a   :  { %361 = vsyncpa [#allocation6 + $0x1], 1 }
 0x13b   :  { %362 = vsyncpa [#allocation4], 1 }
 0x13c   :  { %364 = vsyncpa [#allocation4 + $0x1], 1 }

</bundles_post_ra>
